<compile_context>
chip_gen: v5e
topology: v5e:2x2
jax: 0.10.0
libtpu: 0.0.40
codegen_flags: <defaults>
</compile_context>

<pallas_src>
import jax
import jax.numpy as jnp
from jax.experimental import pallas as pl
from jax.experimental.pallas import tpu as pltpu


def _fused_causal_encoder_kernel(cause_ref, effect_ref, w_ref, b_ref, o_ref,
                                 pooled_ref):
    """Fused CausalEncoder forward.

    cause_ref, effect_ref : [B, S, H]   raw token activations
    w_ref                 : [H, 4D]     dense slab [cause|semantic|effect|semantic] * (1/S)
    b_ref                 : [1, 4D]     [cause_b | semantic_b | effect_b | semantic_b]
    o_ref                 : [2B, 4D]    rows 0:B -> cause projections, B:2B -> effect
    pooled_ref            : [2B, H]     VMEM scratch for the stacked pooled rows
    """
    B = cause_ref.shape[0]

    # Sum-pool over the sequence axis (the 1/S mean scale is folded into
    # w_ref), sublane-stacking cause rows on top of effect rows so a single
    # MXU pass covers all four projections.
    pooled_ref[0:B, :] = jnp.sum(cause_ref[...], axis=1)       # [B, H]
    pooled_ref[B:2 * B, :] = jnp.sum(effect_ref[...], axis=1)  # [B, H]

    # One lane-dense (N = 4D = 128) MXU pass: [2B, H] @ [H, 4D].
    y = jnp.dot(pooled_ref[...], w_ref[...],
                preferred_element_type=jnp.float32)            # [2B, 4D]

    # Bias + tanh (VPU / EUP), single unmasked full-lane store.  The bias row
    # is only "correct" on the blocks the wrapper keeps, which is all we need.
    o_ref[...] = jnp.tanh(y + b_ref[...])


def _fused_encode(cause, effect, w_dense, b_all):
    """One pallas_call computing all four encodings as a [2B, 4D] slab."""
    B, S, H = cause.shape
    D4 = w_dense.shape[1]
    return pl.pallas_call(
        _fused_causal_encoder_kernel,
        out_shape=jax.ShapeDtypeStruct((2 * B, D4), jnp.float32),
        grid=(1,),
        in_specs=[
            pl.BlockSpec((B, S, H), lambda i: (0, 0, 0)),
            pl.BlockSpec((B, S, H), lambda i: (0, 0, 0)),
            pl.BlockSpec((H, D4), lambda i: (0, 0)),
            pl.BlockSpec((1, D4), lambda i: (0, 0)),
        ],
        out_specs=pl.BlockSpec((2 * B, D4), lambda i: (0, 0)),
        scratch_shapes=[pltpu.VMEM((2 * B, H), jnp.float32)],
        compiler_params=pltpu.CompilerParams(
            dimension_semantics=("arbitrary",)),
    )(cause, effect, w_dense, b_all)


def init_params(key, hidden, out_dim):
    """Deterministic params for cause / effect / semantic encoders."""
    keys = jax.random.split(key, 6)
    scale = 1.0 / jnp.sqrt(hidden)

    def lin(kw, kb):
        w = jax.random.normal(kw, (hidden, out_dim), jnp.float32) * scale
        b = jax.random.normal(kb, (out_dim,), jnp.float32) * 0.01
        return w, b

    return {
        "cause": lin(keys[0], keys[1]),
        "effect": lin(keys[2], keys[3]),
        "semantic": lin(keys[4], keys[5]),
    }


def pack_params(params, seq_len):
    """One-time packing of the three weight sets for the fused kernel.

    Dense [H, 4D] slab [cause_W | semantic_W | effect_W | semantic_W] with the
    1/seq_len mean-pool scale folded in, plus a [1, 4D] bias row.  Done once
    at init (not per forward call).
    """
    cw, cb = params["cause"]
    ew, eb = params["effect"]
    sw, sb = params["semantic"]
    inv_s = jnp.float32(1.0 / seq_len)
    w_dense = jnp.concatenate([cw, sw, ew, sw], axis=1) * inv_s   # [H, 4D]
    b_all = jnp.concatenate([cb, sb, eb, sb]).reshape(1, -1)      # [1, 4D]
    return w_dense, b_all


@jax.jit
def causal_encoder_forward(packed, cause, effect):
    """Mirrors CausalEncoder.forward: returns the 4-tuple of encodings."""
    w_dense, b_all = packed
    B = cause.shape[0]
    D = w_dense.shape[1] // 4

    out = _fused_encode(cause, effect, w_dense, b_all)   # [2B, 4D]

    # Rows 0:B carry the cause-side projections, rows B:2B the effect-side.
    cause_encoding = out[0:B, 0:D]
    # semantic_encoder params are frozen and its calls run under torch.no_grad
    # -> stop_gradient on the semantic output slices.
    semantic_cause_encoding = jax.lax.stop_gradient(out[0:B, D:2 * D])
    effect_encoding = out[B:2 * B, 2 * D:3 * D]
    semantic_effect_encoding = jax.lax.stop_gradient(out[B:2 * B, 3 * D:4 * D])

    return (cause_encoding, effect_encoding,
            semantic_cause_encoding, semantic_effect_encoding)


if __name__ == "__main__":
    B, S, H, D = 2, 8, 32, 32  # batch, seq, hidden, embedding dim

    key = jax.random.PRNGKey(0)
    k_in_c, k_in_e, k_params = jax.random.split(key, 3)

    cause = jax.random.normal(k_in_c, (B, S, H), jnp.float32)
    effect = jax.random.normal(k_in_e, (B, S, H), jnp.float32)
    params = init_params(k_params, H, D)
    packed = jax.block_until_ready(pack_params(params, S))  # one-time pack

    outs = causal_encoder_forward(packed, cause, effect)
    outs = jax.block_until_ready(outs)

    # Lightweight sanity check against a pure-JAX reference.
    def ref_encode(x, w, b):
        return jnp.tanh(jnp.mean(x, axis=1) @ w + b)

    ref = (
        ref_encode(cause, *params["cause"]),
        ref_encode(effect, *params["effect"]),
        ref_encode(cause, *params["semantic"]),
        ref_encode(effect, *params["semantic"]),
    )
    for got, want in zip(outs, ref):
        assert got.shape == (B, D)
        assert jnp.allclose(got, want, atol=1e-5, rtol=1e-5)

    print("KERNEL_OK")
</pallas_src>

<mosaic_0001>
module attributes {stable_mosaic.version = 11 : i64} {
  func.func @_fused_causal_encoder_kernel(%arg0: i32, %arg1: memref<2x8x32xf32, #tpu.memory_space<vmem>>, %arg2: memref<2x8x32xf32, #tpu.memory_space<vmem>>, %arg3: memref<32x128xf32, #tpu.memory_space<vmem>>, %arg4: memref<1x128xf32, #tpu.memory_space<vmem>>, %arg5: memref<4x128xf32, #tpu.memory_space<vmem>>, %arg6: memref<4x32xf32, #tpu.memory_space<vmem>>) attributes {dimension_semantics = [#tpu.dimension_semantics<arbitrary>], iteration_bounds = array<i64: 1>, scalar_prefetch = 0 : i64, scratch_operands = 1 : i64, tpu.core_type = #tpu.core_type<tc>, window_params = [{pipeline_mode = #tpu.pipeline_mode<synchronous>, transform_indices = @transform_0, window_bounds = array<i64: 2, 8, 32>}, {pipeline_mode = #tpu.pipeline_mode<synchronous>, transform_indices = @transform_1, window_bounds = array<i64: 2, 8, 32>}, {pipeline_mode = #tpu.pipeline_mode<synchronous>, transform_indices = @transform_2, window_bounds = array<i64: 32, 128>}, {pipeline_mode = #tpu.pipeline_mode<synchronous>, transform_indices = @transform_3, window_bounds = array<i64: 1, 128>}, {pipeline_mode = #tpu.pipeline_mode<synchronous>, transform_indices = @transform_4, window_bounds = array<i64: 4, 128>}]} {
    %c0 = arith.constant 0 : index
    %c0_0 = arith.constant 0 : index
    %c0_1 = arith.constant 0 : index
    %0 = vector.load %arg1[%c0, %c0_0, %c0_1] : memref<2x8x32xf32, #tpu.memory_space<vmem>>, vector<2x8x32xf32>
    %cst = arith.constant dense<0.000000e+00> : vector<2x32xf32>
    %1 = vector.multi_reduction <add>, %0, %cst [1] : vector<2x8x32xf32> to vector<2x32xf32>
    %c0_2 = arith.constant 0 : index
    %c0_3 = arith.constant 0 : index
    %2 = vector.load %arg6[%c0_2, %c0_3] : memref<4x32xf32, #tpu.memory_space<vmem>>, vector<2x32xf32>
    tpu.vector_store %arg6[%c0_2, %c0_3], %1 {strides = array<i32>} : memref<4x32xf32, #tpu.memory_space<vmem>>, vector<2x32xf32>,
    %c0_4 = arith.constant 0 : index
    %c0_5 = arith.constant 0 : index
    %c0_6 = arith.constant 0 : index
    %3 = vector.load %arg2[%c0_4, %c0_5, %c0_6] : memref<2x8x32xf32, #tpu.memory_space<vmem>>, vector<2x8x32xf32>
    %cst_7 = arith.constant dense<0.000000e+00> : vector<2x32xf32>
    %4 = vector.multi_reduction <add>, %3, %cst_7 [1] : vector<2x8x32xf32> to vector<2x32xf32>
    %c2 = arith.constant 2 : index
    %c0_8 = arith.constant 0 : index
    %5 = vector.load %arg6[%c2, %c0_8] : memref<4x32xf32, #tpu.memory_space<vmem>>, vector<2x32xf32>
    tpu.vector_store %arg6[%c2, %c0_8], %4 {strides = array<i32>} : memref<4x32xf32, #tpu.memory_space<vmem>>, vector<2x32xf32>,
    %c0_9 = arith.constant 0 : index
    %c0_10 = arith.constant 0 : index
    %6 = vector.load %arg6[%c0_9, %c0_10] : memref<4x32xf32, #tpu.memory_space<vmem>>, vector<4x32xf32>
    %c0_11 = arith.constant 0 : index
    %c0_12 = arith.constant 0 : index
    %7 = vector.load %arg3[%c0_11, %c0_12] : memref<32x128xf32, #tpu.memory_space<vmem>>, vector<32x128xf32>
    %cst_13 = arith.constant dense<0.000000e+00> : vector<4x128xf32>
    %8 = tpu.matmul %6, %7, %cst_13 {dimension_numbers = #tpu.dot_dimension_numbers<[1], [0], [0], [1], [0, 0, 1, 1], [], []>} : vector<4x32xf32>, vector<32x128xf32>, vector<4x128xf32> -> vector<4x128xf32>
    %c0_14 = arith.constant 0 : index
    %c0_15 = arith.constant 0 : index
    %9 = vector.load %arg4[%c0_14, %c0_15] : memref<1x128xf32, #tpu.memory_space<vmem>>, vector<1x128xf32>
    %10 = vector.broadcast %9 : vector<1x128xf32> to vector<4x128xf32>
    %11 = arith.addf %8, %10 : vector<4x128xf32>
    %12 = math.tanh %11 : vector<4x128xf32>
    %c0_16 = arith.constant 0 : index
    %c0_17 = arith.constant 0 : index
    %13 = vector.load %arg5[%c0_16, %c0_17] : memref<4x128xf32, #tpu.memory_space<vmem>>, vector<4x128xf32>
    tpu.vector_store %arg5[%c0_16, %c0_17], %12 {strides = array<i32>} : memref<4x128xf32, #tpu.memory_space<vmem>>, vector<4x128xf32>,
    return
  }
  func.func @transform_0(%arg0: i32) -> (i32, i32, i32) {
    %c0_i32 = arith.constant 0 : i32
    %c0_i32_0 = arith.constant 0 : i32
    %c0_i32_1 = arith.constant 0 : i32
    %c0_i32_2 = arith.constant 0 : i32
    return %c0_i32, %c0_i32_0, %c0_i32_1 : i32, i32, i32
  }
  func.func @transform_1(%arg0: i32) -> (i32, i32, i32) {
    %c0_i32 = arith.constant 0 : i32
    %c0_i32_0 = arith.constant 0 : i32
    %c0_i32_1 = arith.constant 0 : i32
    %c0_i32_2 = arith.constant 0 : i32
    return %c0_i32, %c0_i32_0, %c0_i32_1 : i32, i32, i32
  }
  func.func @transform_2(%arg0: i32) -> (i32, i32) {
    %c0_i32 = arith.constant 0 : i32
    %c0_i32_0 = arith.constant 0 : i32
    %c0_i32_1 = arith.constant 0 : i32
    return %c0_i32, %c0_i32_0 : i32, i32
  }
  func.func @transform_3(%arg0: i32) -> (i32, i32) {
    %c0_i32 = arith.constant 0 : i32
    %c0_i32_0 = arith.constant 0 : i32
    %c0_i32_1 = arith.constant 0 : i32
    return %c0_i32, %c0_i32_0 : i32, i32
  }
  func.func @transform_4(%arg0: i32) -> (i32, i32) {
    %c0_i32 = arith.constant 0 : i32
    %c0_i32_0 = arith.constant 0 : i32
    %c0_i32_1 = arith.constant 0 : i32
    return %c0_i32, %c0_i32_0 : i32, i32
  }
}

</mosaic_0001>

<bundles_post_ra>
// kernel: causal_encoder_forward.1
= control target key start
LH: loop header
LB: loop body
LE: loop exit
PB: predicated region body
PF: predicated region fallthrough
CT: control target
= control target key end

     0   :  { %9 = vsyncpa [#allocation4], 0  ;;  %s327_s0 = inlined_call_operand.hbm [shape: f32[2,8,32], index: 0, kind: input, shape index: {}]   ;;  %s328_s1 = inlined_call_operand.hbm [shape: f32[2,8,32], index: 1, kind: input, shape index: {}]   ;;  %s329_s2 = inlined_call_operand.hbm [shape: f32[32,128], index: 2, kind: input, shape index: {}]   ;;  %s330_s3 = inlined_call_operand.hbm [shape: f32[1,128], index: 3, kind: input, shape index: {}]   ;;  %s331_s4 = inlined_call_operand.vmem [shape: f32[4,128], index: 4, kind: output, shape index: {}]  }
   0x1   :  { %10 = vsyncpa [#allocation6], 0 }
   0x2   :  { %11 = vsyncpa [#allocation9], 0  ;;  %s29_s17 = sshll.u32 %s328_s1, 4  ;;  %s276_s18 = smov [#allocation5]   ;;  %s30_s17 = int_to_ptr.hbm [resolvable:$true] %s29_s17 }
   0x3   :  { %s31_s19 = sshll.u32 %s276_s18, 4  ;;  %s16_s22 = sshll.u32 %s327_s0, 4  ;;  %s32_s19 = int_to_ptr.vmem [resolvable:$true] %s31_s19  ;;  %s17_s22 = int_to_ptr.hbm [resolvable:$true] %s16_s22 }
   0x4   :  { %s277_s23 = smov 128   ;;  %s278_s24 = smov 8  }
   0x5   :  { %37 = dma.hbm_to_vmem [thread:$0]  %s30_s17, 256, %s32_s19, [#allocation6], %s277_s23, %s277_s23, %s278_s24  }
   0x6   :  { %s279_s25 = smov [#allocation3]   ;;  %s42_s29 = sshll.u32 %s329_s2, 4  ;;  %s43_s29 = int_to_ptr.hbm [resolvable:$true] %s42_s29 }
   0x7   :  { %s18_s26 = sshll.u32 %s279_s25, 4  ;;  %s56_s5 = sshll.u32 %s330_s3, 4  ;;  %s19_s26 = int_to_ptr.vmem [resolvable:$true] %s18_s26  ;;  %s57_s5 = int_to_ptr.hbm [resolvable:$true] %s56_s5 }
   0x8   :  { %24 = dma.hbm_to_vmem [thread:$0]  %s17_s22, 256, %s19_s26, [#allocation4], %s277_s23, %s277_s23, %s278_s24  }
   0x9   :  { %s280_s6 = smov [#allocation7]   ;;  %s281_s0 = smov [#allocation8]  }
   0xa   :  { %s44_s7 = sshll.u32 %s280_s6, 4  ;;  %s58_s8 = sshll.u32 %s281_s0, 4  ;;  %s45_s7 = int_to_ptr.vmem [resolvable:$true] %s44_s7  ;;  %s59_s8 = int_to_ptr.vmem [resolvable:$true] %s58_s8 }
   0xb   :  { %50 = dma.hbm_to_vmem [thread:$0]  %s43_s29, 512, %s45_s7, [#allocation6], %s277_s23, %s277_s23, %s278_s24  }
   0xc   :  { %61 = dma.hbm_to_vmem [thread:$0]  %s57_s5, 16, %s59_s8, [#allocation9]  }
   0xd   :  { %270 = dma.done.wait [#allocation4], 256  }
   0xe   :  { %271 = vsyncadd [#allocation4], 4294967040 }
   0xf   :  { %272 = dma.done.wait [#allocation6], 768  }
  0x10   :  { %273 = vsyncadd [#allocation6], 4294966528 }
  0x11   :  { %274 = dma.done.wait [#allocation9], 16  }
  0x12   :  { %275 = vsyncadd [#allocation9], 4294967280  ;;  %vm80_vm0 = vcmask 261120   ;;  %v127_v0 = vld [vmem:[#allocation7 + $0x18] sm:$0xff]  ;;  %v126_v1 = vld [vmem:[#allocation7 + $0x10] sm:$0xff]  ;;  %vm97_vm1 = vcmask 1041409  }
  0x13   :  { %147 = vmatpush.msra.mxu0 %v127_v0  ;;  %v125_v2 = vld [vmem:[#allocation7 + $0x8] sm:$0xff]  ;;  %v78_v3 = vld [vmem:[#allocation3] sm:$0xff]  ;;  %v102_v7 = vld [vmem:[#allocation5] sm:$0xff]  ;;  %vm100_vm2 = vcmask 254976  }
  0x14   :  { %v79_v4 = vld [vmem:[#allocation3 + $0x8] sm:$0xff]  ;;  %v81_v5 = vsel %vm80_vm0, %v78_v3, 0.0  ;;  %v103_v8 = vld [vmem:[#allocation5 + $0x8] sm:$0xff]  ;;  %v104_v11 = vsel %vm80_vm0, %v102_v7, 0.0  ;;  %v124_v13 = vld [vmem:[#allocation7] sm:$0xff] }
  0x15   :  { %v88_v6 = vsel %vm80_vm0, %v79_v4, 0.0  ;;  %148 = vmatpush.msra.mxu0 %v126_v1  ;;  %v82_v9 = vrot.slane %v81_v5, 4  ;;  %v111_v12 = vsel %vm80_vm0, %v103_v8, 0.0  ;;  %v105_v14 = vrot.slane %v104_v11, 4  ;;  %v171_v39 = vld [vmem:[#allocation8] ss:$0 sm:$0xff] }
  0x16   :  { %v89_v10 = vrot.slane %v88_v6, 4  ;;  %v112_v15 = vrot.slane %v111_v12, 4 }
  0x17   :  { %149 = vmatpush.msra.mxu0 %v125_v2  ;;  %v83_v16 = vadd.f32 %v82_v9, %v81_v5  ;;  %v106_v18 = vadd.f32 %v105_v14, %v104_v11 }
  0x18   :  { %v90_v17 = vadd.f32 %v89_v10, %v88_v6  ;;  %v113_v19 = vadd.f32 %v112_v15, %v111_v12 }
  0x19   :  { %150 = vmatpush.msra.mxu0 %v124_v13  ;;  %v84_v20 = vrot.slane %v83_v16, 2  ;;  %v107_v22 = vrot.slane %v106_v18, 2 }
  0x1a   :  { %v91_v21 = vrot.slane %v90_v17, 2  ;;  %v114_v23 = vrot.slane %v113_v19, 2 }
  0x1b   :  { %v85_v24 = vadd.f32 %v84_v20, %v83_v16  ;;  %v108_v26 = vadd.f32 %v107_v22, %v106_v18 }
  0x1c   :  { %v92_v25 = vadd.f32 %v91_v21, %v90_v17  ;;  %v115_v27 = vadd.f32 %v114_v23, %v113_v19 }
  0x1d   :  { %v86_v28 = vrot.slane %v85_v24, 1  ;;  %v109_v30 = vrot.slane %v108_v26, 1 }
  0x1e   :  { %v93_v29 = vrot.slane %v92_v25, 1  ;;  %v116_v31 = vrot.slane %v115_v27, 1 }
  0x1f   :  { %v87_v32 = vadd.f32 %v86_v28, %v85_v24  ;;  %v110_v34 = vadd.f32 %v109_v30, %v108_v26 }
  0x20   :  { %v94_v33 = vadd.f32 %v93_v29, %v92_v25  ;;  %v117_v35 = vadd.f32 %v116_v31, %v115_v27 }
  0x22   :  { %v98_v36 = vsel %vm97_vm1, %v94_v33, %v87_v32  ;;  %v120_v37 = vsel %vm97_vm1, %v117_v35, %v110_v34 }
  0x23   :  { %101 = vst.msk [vmem:[#allocation2] sm:$0x3] %vm100_vm2, %v98_v36 }
  0x24   :  { %122 = vst.msk [vmem:[#allocation2 + $0x2] sm:$0x3] %vm100_vm2, %v120_v37 }
  0x2b   :  { %v123_v38 = vld [vmem:[#allocation2] sm:$0xf] }
  0x2c   :  { %164 = vmatmul.msk.f32.vlgmr.msra.gmra.mxu0 %vm80_vm0, %v123_v38 }
  0xa9   :  { %v152_v40 = vpop.f32.mrf.mxu0 }
  0xaa   :  { %v153_v41 = vadd.f32 %v171_v39, %v152_v40 }
  0xac   :  { %172 = vtanh.f32 %v153_v41 }
  0xb2   :  { %v173_v42 = vpop.eup %172 }
  0xb3   :  { %156 = vst [vmem:[%s331_s4] sm:$0xf] %v173_v42 }
  0xb4   :  { %161 = vsyncpa [#allocation4], 1 }
  0xb5   :  { %162 = vsyncpa [#allocation6], 1 }
  0xb6   :  { %163 = vsyncpa [#allocation9], 1 }

</bundles_post_ra>
